<compile_context>
chip_gen: v7x
topology: tpu7x:2x2x1
jax: 0.10.0
libtpu: 0.0.40
codegen_flags: <defaults>
</compile_context>

<pallas_src>
import numpy as np

import jax
import jax.numpy as jnp
from jax.experimental import pallas as pl
from jax.experimental.pallas import tpu as pltpu


def _round_up(x: int, m: int) -> int:
    return ((x + m - 1) // m) * m


def _embed_kernel(t_ref, freqs_ref, phase_ref, w1_ref, w2_ref, b2_ref, o_ref):
    t = t_ref[...]                                          # (tb, 1) f32
    # Sinusoidal PE with a single sin: even lanes phase=0 (sin), odd lanes
    # phase=pi/2 (cos).  Lane d_pad-1 has freq=0, phase=pi/2 -> constant 1,
    # which carries the folded lin1 bias through w1.  Padded lanes in between
    # have freq=phase=0 and zero w1 rows -> no contribution.
    pe = jnp.sin(t * freqs_ref[...] + phase_ref[...])       # (tb, d_pad) f32
    # MLP: lin2(relu(lin1(pe))).  bf16 operands on the MXU, f32 accumulation.
    h = jnp.dot(pe.astype(w1_ref.dtype), w1_ref[...],
                preferred_element_type=jnp.float32)          # (tb, out)
    h = jnp.maximum(h, 0.0)
    o_ref[...] = (
        jnp.dot(h.astype(w2_ref.dtype), w2_ref[...],
                preferred_element_type=jnp.float32)
        + b2_ref[...]
    )


def learnable_sinusoidal_embedding(t, w1, b1, w2, b2, *, latent_dim: int,
                                   max_period: float = 10000.0,
                                   block_b: int = 2048,
                                   matmul_dtype=jnp.bfloat16):
    """t: (B,1)|(B,)|int; w1: (latent, out); b1: (1, out); w2: (out, out); b2: (1, out)."""
    assert latent_dim % 2 == 0, "latent_dim must be even (module asserts dim % 2 == 0)"
    t = jnp.asarray(t, jnp.float32).reshape(-1, 1)           # int t -> (1, 1)
    B = t.shape[0]
    output_dim = w1.shape[1]

    # --- trace-time constants: per-lane freqs & phase, lane-padded ----------
    # +1 reserves a constant-1 "bias lane" even when latent_dim is already a
    # multiple of 128.
    d_pad = max(128, _round_up(latent_dim + 1, 128))
    lane = np.arange(latent_dim)
    freqs = np.power(float(max_period),
                     -(2.0 / latent_dim) * (lane // 2)).astype(np.float32)
    phase = np.where(lane % 2 == 0, 0.0, np.pi / 2.0).astype(np.float32)
    freqs_p = np.zeros((1, d_pad), np.float32)
    phase_p = np.zeros((1, d_pad), np.float32)
    freqs_p[0, :latent_dim] = freqs
    phase_p[0, :latent_dim] = phase
    phase_p[0, d_pad - 1] = np.pi / 2.0                      # bias lane: pe == 1

    # Zero-pad w1 rows to d_pad and fold b1 into the bias-lane row; cast the
    # matmul operands to bf16 once on the host.
    w1_p = jnp.zeros((d_pad, output_dim), jnp.float32)
    w1_p = w1_p.at[:latent_dim, :].set(jnp.asarray(w1, jnp.float32))
    w1_p = w1_p.at[d_pad - 1, :].set(jnp.reshape(jnp.asarray(b1, jnp.float32), (-1,)))
    w1_p = w1_p.astype(matmul_dtype)
    w2_c = jnp.asarray(w2, jnp.float32).astype(matmul_dtype)
    b2_r = jnp.reshape(jnp.asarray(b2, jnp.float32), (1, output_dim))

    # --- batch tiling --------------------------------------------------------
    # Big tiles amortize the ~0.35us/grid-step overhead; cap at half the batch
    # (rounded to 256) so there are >= 2 grid steps for v7x megacore sharding.
    # VMEM is not a constraint: even tb=2048 uses only a few MiB.
    half = _round_up((B + 1) // 2, 256)
    tb_target = min(block_b, max(256, half))
    tb = min(tb_target, _round_up(B, 8))                     # sublane-aligned
    num_blocks = (B + tb - 1) // tb                          # ragged last block OK

    out = pl.pallas_call(
        _embed_kernel,
        out_shape=jax.ShapeDtypeStruct((B, output_dim), jnp.float32),
        grid=(num_blocks,),
        in_specs=[
            pl.BlockSpec((tb, 1), lambda i: (i, 0)),                    # t tile
            pl.BlockSpec((1, d_pad), lambda i: (0, 0)),                 # freqs (resident)
            pl.BlockSpec((1, d_pad), lambda i: (0, 0)),                 # phase (resident)
            pl.BlockSpec((d_pad, output_dim), lambda i: (0, 0)),        # w1+b1 (resident)
            pl.BlockSpec((output_dim, output_dim), lambda i: (0, 0)),   # w2 (resident)
            pl.BlockSpec((1, output_dim), lambda i: (0, 0)),            # b2 (resident)
        ],
        # output_dim defaults to 128 -> lane-dense unmasked stores; keep it a
        # multiple of 128 if the module is reconfigured.
        out_specs=pl.BlockSpec((tb, output_dim), lambda i: (i, 0)),
        compiler_params=pltpu.CompilerParams(
            dimension_semantics=("parallel",)),               # megacore on v7x
    )(t, jnp.asarray(freqs_p), jnp.asarray(phase_p), w1_p, w2_c, b2_r)

    return out


def _reference(t, w1, b1, w2, b2, latent_dim, max_period):
    """Pure-numpy reference mirroring the PyTorch module (f32)."""
    t = np.asarray(t, np.float32).reshape(-1, 1)
    k = np.arange(0, latent_dim // 2)
    freqs = 1.0 / np.power(max_period, 2.0 / latent_dim * k)
    arg = freqs[None, :] * t                                  # (B, dim//2)
    pe = np.zeros((t.shape[0], latent_dim), np.float32)
    pe[:, 0::2] = np.sin(arg)
    pe[:, 1::2] = np.cos(arg)
    h = np.maximum(pe @ np.asarray(w1) + np.asarray(b1), 0.0)
    return h @ np.asarray(w2) + np.asarray(b2)


if __name__ == "__main__":
    # Module defaults: output_dim=128, latent_dim=50, max_period=10000
    output_dim = 128
    latent_dim = 50
    max_period = 10000.0

    key = jax.random.PRNGKey(0)
    k_t1, k_t2, k_w1, k_b1, k_w2, k_b2 = jax.random.split(key, 6)

    # Deterministic synthetic parameters (PyTorch-Linear-like uniform init),
    # stored as (in, out) for the kernel.
    lim1 = 1.0 / np.sqrt(latent_dim)
    lim2 = 1.0 / np.sqrt(output_dim)
    w1 = jax.random.uniform(k_w1, (latent_dim, output_dim), jnp.float32, -lim1, lim1)
    b1 = jax.random.uniform(k_b1, (1, output_dim), jnp.float32, -lim1, lim1)
    w2 = jax.random.uniform(k_w2, (output_dim, output_dim), jnp.float32, -lim2, lim2)
    b2 = jax.random.uniform(k_b2, (1, output_dim), jnp.float32, -lim2, lim2)

    # bf16 matmul tolerance (pe in [-1,1], small weights -> abs err << 3e-2).
    rtol = atol = 3e-2

    # Case 1: batch=8, single tile.
    t8 = jax.random.uniform(k_t1, (8, 1), jnp.float32, 0.0, 1000.0)
    out8 = jax.block_until_ready(learnable_sinusoidal_embedding(
        t8, w1, b1, w2, b2, latent_dim=latent_dim, max_period=max_period))
    ref8 = _reference(np.asarray(t8), w1, b1, w2, b2, latent_dim, max_period)
    np.testing.assert_allclose(np.asarray(out8), ref8, rtol=rtol, atol=atol)

    # Case 2: batch=20 with a tiny forced tile (block_b=16) to exercise the
    # multi-step grid and the ragged (masked) last output block.
    t20 = jax.random.uniform(k_t2, (20, 1), jnp.float32, 0.0, 1000.0)
    out20 = jax.block_until_ready(learnable_sinusoidal_embedding(
        t20, w1, b1, w2, b2, latent_dim=latent_dim, max_period=max_period,
        block_b=16))
    ref20 = _reference(np.asarray(t20), w1, b1, w2, b2, latent_dim, max_period)
    np.testing.assert_allclose(np.asarray(out20), ref20, rtol=rtol, atol=atol)

    print("KERNEL_OK")
</pallas_src>

<mosaic_0001>
module attributes {stable_mosaic.version = 11 : i64} {
  func.func @_embed_kernel(%arg0: i32, %arg1: memref<8x1xf32, #tpu.memory_space<vmem>>, %arg2: memref<1x128xf32, #tpu.memory_space<vmem>>, %arg3: memref<1x128xf32, #tpu.memory_space<vmem>>, %arg4: memref<128x128xbf16, #tpu.memory_space<vmem>>, %arg5: memref<128x128xbf16, #tpu.memory_space<vmem>>, %arg6: memref<1x128xf32, #tpu.memory_space<vmem>>, %arg7: memref<8x128xf32, #tpu.memory_space<vmem>>) attributes {dimension_semantics = [#tpu.dimension_semantics<parallel>], iteration_bounds = array<i64: 1>, scalar_prefetch = 0 : i64, scratch_operands = 0 : i64, tpu.core_type = #tpu.core_type<tc>, window_params = [{transform_indices = @transform_0, window_bounds = array<i64: 8, 1>}, {pipeline_mode = #tpu.pipeline_mode<synchronous>, transform_indices = @transform_1, window_bounds = array<i64: 1, 128>}, {pipeline_mode = #tpu.pipeline_mode<synchronous>, transform_indices = @transform_2, window_bounds = array<i64: 1, 128>}, {pipeline_mode = #tpu.pipeline_mode<synchronous>, transform_indices = @transform_3, window_bounds = array<i64: 128, 128>}, {pipeline_mode = #tpu.pipeline_mode<synchronous>, transform_indices = @transform_4, window_bounds = array<i64: 128, 128>}, {pipeline_mode = #tpu.pipeline_mode<synchronous>, transform_indices = @transform_5, window_bounds = array<i64: 1, 128>}, {transform_indices = @transform_6, window_bounds = array<i64: 8, 128>}]} {
    %c0 = arith.constant 0 : index
    %c0_0 = arith.constant 0 : index
    %0 = vector.load %arg1[%c0, %c0_0] : memref<8x1xf32, #tpu.memory_space<vmem>>, vector<8x1xf32>
    %c0_1 = arith.constant 0 : index
    %c0_2 = arith.constant 0 : index
    %1 = vector.load %arg2[%c0_1, %c0_2] : memref<1x128xf32, #tpu.memory_space<vmem>>, vector<1x128xf32>
    %2 = vector.broadcast %0 : vector<8x1xf32> to vector<8x128xf32>
    %3 = vector.broadcast %1 : vector<1x128xf32> to vector<8x128xf32>
    %4 = arith.mulf %2, %3 : vector<8x128xf32>
    %c0_3 = arith.constant 0 : index
    %c0_4 = arith.constant 0 : index
    %5 = vector.load %arg3[%c0_3, %c0_4] : memref<1x128xf32, #tpu.memory_space<vmem>>, vector<1x128xf32>
    %6 = vector.broadcast %5 : vector<1x128xf32> to vector<8x128xf32>
    %7 = arith.addf %4, %6 : vector<8x128xf32>
    %8 = math.sin %7 : vector<8x128xf32>
    %9 = arith.truncf %8 : vector<8x128xf32> to vector<8x128xbf16>
    %c0_5 = arith.constant 0 : index
    %c0_6 = arith.constant 0 : index
    %10 = vector.load %arg4[%c0_5, %c0_6] : memref<128x128xbf16, #tpu.memory_space<vmem>>, vector<128x128xbf16>
    %cst = arith.constant dense<0.000000e+00> : vector<8x128xf32>
    %11 = tpu.matmul %9, %10, %cst {dimension_numbers = #tpu.dot_dimension_numbers<[1], [0], [0], [1], [0, 0, 1, 1], [], []>} : vector<8x128xbf16>, vector<128x128xbf16>, vector<8x128xf32> -> vector<8x128xf32>
    %cst_7 = arith.constant 0.000000e+00 : f32
    %12 = vector.broadcast %cst_7 : f32 to vector<8x128xf32>
    %13 = arith.maximumf %11, %12 : vector<8x128xf32>
    %14 = arith.truncf %13 : vector<8x128xf32> to vector<8x128xbf16>
    %c0_8 = arith.constant 0 : index
    %c0_9 = arith.constant 0 : index
    %15 = vector.load %arg5[%c0_8, %c0_9] : memref<128x128xbf16, #tpu.memory_space<vmem>>, vector<128x128xbf16>
    %cst_10 = arith.constant dense<0.000000e+00> : vector<8x128xf32>
    %16 = tpu.matmul %14, %15, %cst_10 {dimension_numbers = #tpu.dot_dimension_numbers<[1], [0], [0], [1], [0, 0, 1, 1], [], []>} : vector<8x128xbf16>, vector<128x128xbf16>, vector<8x128xf32> -> vector<8x128xf32>
    %c0_11 = arith.constant 0 : index
    %c0_12 = arith.constant 0 : index
    %17 = vector.load %arg6[%c0_11, %c0_12] : memref<1x128xf32, #tpu.memory_space<vmem>>, vector<1x128xf32>
    %18 = vector.broadcast %17 : vector<1x128xf32> to vector<8x128xf32>
    %19 = arith.addf %16, %18 : vector<8x128xf32>
    %c0_13 = arith.constant 0 : index
    %c0_14 = arith.constant 0 : index
    %20 = vector.load %arg7[%c0_13, %c0_14] : memref<8x128xf32, #tpu.memory_space<vmem>>, vector<8x128xf32>
    tpu.vector_store %arg7[%c0_13, %c0_14], %19 {strides = array<i32>} : memref<8x128xf32, #tpu.memory_space<vmem>>, vector<8x128xf32>,
    return
  }
  func.func @transform_0(%arg0: i32) -> (i32, i32) {
    %c0_i32 = arith.constant 0 : i32
    %c0_i32_0 = arith.constant 0 : i32
    return %arg0, %c0_i32 : i32, i32
  }
  func.func @transform_1(%arg0: i32) -> (i32, i32) {
    %c0_i32 = arith.constant 0 : i32
    %c0_i32_0 = arith.constant 0 : i32
    %c0_i32_1 = arith.constant 0 : i32
    return %c0_i32, %c0_i32_0 : i32, i32
  }
  func.func @transform_2(%arg0: i32) -> (i32, i32) {
    %c0_i32 = arith.constant 0 : i32
    %c0_i32_0 = arith.constant 0 : i32
    %c0_i32_1 = arith.constant 0 : i32
    return %c0_i32, %c0_i32_0 : i32, i32
  }
  func.func @transform_3(%arg0: i32) -> (i32, i32) {
    %c0_i32 = arith.constant 0 : i32
    %c0_i32_0 = arith.constant 0 : i32
    %c0_i32_1 = arith.constant 0 : i32
    return %c0_i32, %c0_i32_0 : i32, i32
  }
  func.func @transform_4(%arg0: i32) -> (i32, i32) {
    %c0_i32 = arith.constant 0 : i32
    %c0_i32_0 = arith.constant 0 : i32
    %c0_i32_1 = arith.constant 0 : i32
    return %c0_i32, %c0_i32_0 : i32, i32
  }
  func.func @transform_5(%arg0: i32) -> (i32, i32) {
    %c0_i32 = arith.constant 0 : i32
    %c0_i32_0 = arith.constant 0 : i32
    %c0_i32_1 = arith.constant 0 : i32
    return %c0_i32, %c0_i32_0 : i32, i32
  }
  func.func @transform_6(%arg0: i32) -> (i32, i32) {
    %c0_i32 = arith.constant 0 : i32
    %c0_i32_0 = arith.constant 0 : i32
    return %arg0, %c0_i32 : i32, i32
  }
}

</mosaic_0001>

<bundles_post_ra>
// kernel: tpu_custom_call.1
= control target key start
LH: loop header
LB: loop body
LE: loop exit
PB: predicated region body
PF: predicated region fallthrough
CT: control target
= control target key end

     0   :  { %11 = vsyncpa [#allocation3], 0  ;;  %s724_s0 = inlined_call_operand.vmem [shape: f32[8,1], index: 0, kind: input, shape index: {}]   ;;  %s725_s1 = inlined_call_operand.vmem [shape: f32[1,128], index: 1, kind: input, shape index: {}]   ;;  %s726_s2 = inlined_call_operand.vmem [shape: f32[1,128], index: 2, kind: input, shape index: {}]   ;;  %s727_s3 = inlined_call_operand.hbm [shape: bf16[128,128], index: 3, kind: input, shape index: {}]   ;;  %s728_s4 = inlined_call_operand.hbm [shape: bf16[128,128], index: 4, kind: input, shape index: {}]   ;;  %s729_s5 = inlined_call_operand.vmem [shape: f32[1,128], index: 5, kind: input, shape index: {}]   ;;  %s730_s6 = inlined_call_operand.hbm [shape: f32[8,128], index: 6, kind: output, shape index: {}]  }
   0x1   :  { %12 = vsyncpa [#allocation6], 0 }
   0x2   :  { %13 = vsyncpa [#allocation4], 0  ;;  %s606_s21 = smov [#allocation2]   ;;  %s534_s25 = scalar_lea.hbm %s727_s3, 1024 }
   0x3   :  { %s25_s22 = sshll.u32 %s606_s21, 4  ;;  %p535_p0 = scmp.ne.s32.totalorder %s727_s3, %s534_s25  ;;  %s26_s22 = int_to_ptr.vmem [resolvable:$true] %s25_s22 }
   0x4   :  { %p538_p1 = scmp.lt.u32.totalorder %s534_s25, %s727_s3 }
   0x6   :  { %p540_p2 = pnand %p538_p1, %p535_p0 }
   0x8   :  { %543 = shalt.err (!%p540_p2)
}
   0x9   :  { %s544_s30 = scalar_lea.vmem %s26_s22, 1024  ;;  %p549_p4 = scmp.lt.s32.totalorder %s26_s22, %s26_s22 }
   0xa   :  { %p545_p3 = scmp.ne.s32.totalorder %s26_s22, %s544_s30  ;;  %p550_p5 = scmp.lt.s32.totalorder %s544_s30, %s544_s30 }
   0xc   :  { %p551_p6 = por %p550_p5, %p549_p4 }
   0xe   :  { %p552_p7 = pnand %p551_p6, %p545_p3 }
  0x10   :  { %555 = shalt.err (!%p552_p7)
}
  0x11   :  { %s607_s7 = smov 64   ;;  %s608_s8 = smov 4  }
  0x12   :  { %31 = dma.hbm_to_vmem [thread:$0]  %s727_s3, 1024, %s26_s22, [#allocation3], %s607_s7, %s607_s7, %s608_s8  }
  0x13   :  { %s609_s11 = smov [#allocation5]   ;;  %s556_s15 = scalar_lea.hbm %s728_s4, 1024 }
  0x14   :  { %s37_s12 = sshll.u32 %s609_s11, 4  ;;  %p557_p8 = scmp.ne.s32.totalorder %s728_s4, %s556_s15  ;;  %s38_s12 = int_to_ptr.vmem [resolvable:$true] %s37_s12 }
  0x15   :  { %p560_p9 = scmp.lt.u32.totalorder %s556_s15, %s728_s4 }
  0x17   :  { %p562_p10 = pnand %p560_p9, %p557_p8 }
  0x19   :  { %565 = shalt.err (!%p562_p10)
}
  0x1a   :  { %s566_s20 = scalar_lea.vmem %s38_s12, 1024  ;;  %p571_p12 = scmp.lt.s32.totalorder %s38_s12, %s38_s12 }
  0x1b   :  { %p567_p11 = scmp.ne.s32.totalorder %s38_s12, %s566_s20  ;;  %p572_p13 = scmp.lt.s32.totalorder %s566_s20, %s566_s20 }
  0x1d   :  { %p573_p0 = por %p572_p13, %p571_p12 }
  0x1f   :  { %p574_p1 = pnand %p573_p0, %p567_p11 }
  0x21   :  { %577 = shalt.err (!%p574_p1)
}
  0x22   :  { %43 = dma.hbm_to_vmem [thread:$0]  %s728_s4, 1024, %s38_s12, [#allocation6], %s607_s7, %s607_s7, %s608_s8  }
  0x23   :  { %600 = dma.done.wait [#allocation3], 1024  }
  0x24   :  { %601 = vsyncadd [#allocation3], 4294966272 }
  0x25   :  { %602 = dma.done.wait [#allocation6], 1024  }
  0x26   :  { %603 = vsyncadd [#allocation6], 4294966272  ;;  %v610_v0 = vmov 0   ;;  %v53_v1 = vld [vmem:[%s724_s0] sm:$0xff]  ;;  %v611_v3 = vmov 0.0   ;;  %v515_v4 = vld [vmem:[#allocation2 + $0x8] sm:$0xff]  }
  0x27   :  { %513 = vset.pattern.permute.xlu0 %v610_v0  ;;  %v514_v2 = vld [vmem:[#allocation2] sm:$0xff]   ;;  %455 = vmatprep.subr.bf16.mxu0 %v611_v3  ;;  %v516_v5 = vld [vmem:[#allocation2 + $0x10] sm:$0xff]   ;;  %v517_v6 = vld [vmem:[#allocation2 + $0x18] sm:$0xff]   ;;  %vm612_vm0 = vmmov 0   ;;  %v613_v33 = vmov 683565275  }
  0x28   :  { %57 = vperm.xlu0 %513, %v53_v1   ;;  %475 = vmatprep.subr.bf16.mxu1 %v611_v3  ;;  %v518_v7 = vld [vmem:[#allocation2 + $0x20] sm:$0xff]   ;;  %v519_v8 = vld [vmem:[#allocation2 + $0x28] sm:$0xff]   ;;  %v520_v9 = vld [vmem:[#allocation2 + $0x30] sm:$0xff]   ;;  %v614_v35 = vmov 2475754826   ;;  %s619_s26 = smov [#allocation7]  }
  0x29   :  { %456 = vmatpush3.bf16.msra.mxu0 %v514_v2  ;;  %471 = vmatprep.mubr.msk.bf16.mxu0 %vm612_vm0, %v611_v3  ;;  %v521_v10 = vld [vmem:[#allocation2 + $0x38] sm:$0xff]   ;;  %v522_v11 = vld [vmem:[#allocation5] sm:$0xff]   ;;  %v523_v12 = vld [vmem:[#allocation5 + $0x8] sm:$0xff]   ;;  %v615_v38 = vmov 2131351028   ;;  %s404_s27 = sshll.u32 %s619_s26, 4  ;;  %s405_s27 = int_to_ptr.vmem [resolvable:$true] %s404_s27 }
  0x2a   :  { %457 = vmatprep.subr.bf16.mxu0 %v611_v3  ;;  %491 = vmatprep.mubr.msk.bf16.mxu1 %vm612_vm0, %v611_v3  ;;  %v524_v13 = vld [vmem:[#allocation5 + $0x10] sm:$0xff]   ;;  %v525_v14 = vld [vmem:[#allocation5 + $0x18] sm:$0xff]   ;;  %v526_v15 = vld [vmem:[#allocation5 + $0x20] sm:$0xff]   ;;  %v616_v41 = vmov 2102212464   ;;  %s578_s28 = scalar_lea.vmem %s405_s27, 128  ;;  %p583_p3 = scmp.lt.s32.totalorder %s405_s27, %s405_s27 }
  0x2b   :  { %476 = vmatpush3.bf16.msra.mxu1 %v522_v11  ;;  %v527_v16 = vld [vmem:[#allocation5 + $0x28] sm:$0xff]   ;;  %v528_v17 = vld [vmem:[#allocation5 + $0x30] sm:$0xff]   ;;  %v414_v18 = vld [vmem:[%s725_s1] ss:$0 sm:$0xff]  ;;  %v617_v44 = vmov 920167782   ;;  %p579_p2 = scmp.ne.s32.totalorder %s405_s27, %s578_s28  ;;  %p584_p4 = scmp.lt.s32.totalorder %s578_s28, %s578_s28 }
  0x2c   :  { %477 = vmatprep.subr.bf16.mxu1 %v611_v3  ;;  %v415_v19 = vld [vmem:[%s726_s2] ss:$0 sm:$0xff]  ;;  %v618_v47 = vmov 1326507024  }
  0x2d   :  { %458 = vmatpush3.bf16.msra.mxu0 %v515_v4  ;;  %p585_p5 = por %p584_p4, %p583_p3 }
  0x2e   :  { %459 = vmatprep.subr.bf16.mxu0 %v611_v3 }
  0x2f   :  { %478 = vmatpush3.bf16.msra.mxu1 %v523_v12  ;;  %p586_p6 = pnand %p585_p5, %p579_p2 }
  0x30   :  { %479 = vmatprep.subr.bf16.mxu1 %v611_v3 }
  0x31   :  { %460 = vmatpush3.bf16.msra.mxu0 %v516_v5 }
  0x32   :  { %461 = vmatprep.subr.bf16.mxu0 %v611_v3 }
  0x33   :  { %480 = vmatpush3.bf16.msra.mxu1 %v524_v13 }
  0x34   :  { %481 = vmatprep.subr.bf16.mxu1 %v611_v3 }
  0x35   :  { %462 = vmatpush3.bf16.msra.mxu0 %v517_v6 }
  0x36   :  { %463 = vmatprep.subr.bf16.mxu0 %v611_v3 }
  0x37   :  { %482 = vmatpush3.bf16.msra.mxu1 %v525_v14 }
  0x38   :  { %483 = vmatprep.subr.bf16.mxu1 %v611_v3 }
  0x39   :  { %464 = vmatpush3.bf16.msra.mxu0 %v518_v7 }
  0x3a   :  { %465 = vmatprep.subr.bf16.mxu0 %v611_v3 }
  0x3b   :  { %484 = vmatpush3.bf16.msra.mxu1 %v526_v15 }
  0x3c   :  { %485 = vmatprep.subr.bf16.mxu1 %v611_v3 }
  0x3d   :  { %466 = vmatpush3.bf16.msra.mxu0 %v519_v8 }
  0x3e   :  { %467 = vmatprep.subr.bf16.mxu0 %v611_v3 }
  0x3f   :  { %486 = vmatpush3.bf16.msra.mxu1 %v527_v16 }
  0x40   :  { %487 = vmatprep.subr.bf16.mxu1 %v611_v3 }
  0x41   :  { %468 = vmatpush3.bf16.msra.mxu0 %v520_v9 }
  0x42   :  { %469 = vmatprep.subr.bf16.mxu0 %v611_v3 }
  0x43   :  { %488 = vmatpush3.bf16.msra.mxu1 %v528_v17 }
  0x44   :  { %489 = vmatprep.subr.bf16.mxu1 %v611_v3 }
  0x45   :  { %470 = vmatpush3.bf16.msra.mxu0 %v521_v10 }
  0xa7   :  { %v58_v20 = vpop.permute.xlu0 %57 }
  0xa8   :  { %v66_v21 = vmul.f32 %v414_v18, %v58_v20 }
  0xaa   :  { %v688_v22 = vadd.f32 %v415_v19, %v66_v21 }
  0xac   :  { %v78_v23 = vand.u32 2139095040, %v688_v22  ;;  %v75_v27 = vand.u32 2147483647, %v688_v22  ;;  %vm77_vm8 = vcmp.lt.s32.totalorder %v688_v22, 0  ;;  %vm167_vm13 = vweird.f32 %v688_v22 }
  0xae   :  { %v79_v24 = vshrl.u32 %v78_v23, 23  ;;  %v82_v30 = vand.u32 8388607, %v75_v27  ;;  %vm76_vm9 = vcmp.le.f32.partialorder %v75_v27, 0.7853982 }
  0xb0   :  { %v416_v25 = vadd.s32 4294967169, %v79_v24  ;;  %v83_v49 = vor.u32 8388608, %v82_v30 }
  0xb2   :  { %v85_v26 = vadd.s32 1, %v416_v25  ;;  %v123_v63 = vshll.u32 %v83_v49, 8 }
  0xb4   :  { %vm86_vm1 = vcmp.gt.s32.totalorder %v85_v26, 0 }
  0xb5   :  { %v87_v28 = vsel %vm86_vm1, %v85_v26, 0 }
  0xb6   :  { %v89_v29 = vand.u32 31, %v87_v28  ;;  %v88_v32 = vshrl.u32 %v87_v28, 5 }
  0xb8   :  { %v90_v31 = vsub.s32 32, %v89_v29  ;;  %v92_v34 = vshll.u32 %v613_v33, %v89_v29  ;;  %v95_v36 = vshll.u32 %v614_v35, %v89_v29  ;;  %v98_v40 = vshll.u32 %v615_v38, %v89_v29 }
  0xb9   :  { %v101_v43 = vshll.u32 %v616_v41, %v89_v29  ;;  %v104_v46 = vshll.u32 %v617_v44, %v89_v29  ;;  %vm107_vm2 = vcmp.lt.s32.totalorder %v88_v32, 1  ;;  %vm110_vm3 = vcmp.lt.s32.totalorder %v88_v32, 4 }
  0xba   :  { %v93_v37 = vshrl.u32 %v614_v35, %v90_v31  ;;  %v96_v39 = vshrl.u32 %v615_v38, %v90_v31  ;;  %v99_v42 = vshrl.u32 %v616_v41, %v90_v31  ;;  %v102_v45 = vshrl.u32 %v617_v44, %v90_v31 }
  0xbb   :  { %v105_v48 = vshrl.u32 %v618_v47, %v90_v31  ;;  %v91_v58 = vshrl.u32 %v613_v33, %v90_v31  ;;  %vm109_vm4 = vcmp.lt.s32.totalorder %v88_v32, 3  ;;  %vm108_vm5 = vcmp.lt.s32.totalorder %v88_v32, 2 }
  0xbc   :  { %v94_v50 = vor.u32 %v93_v37, %v92_v34  ;;  %v97_v51 = vor.u32 %v96_v39, %v95_v36  ;;  %v100_v52 = vor.u32 %v99_v42, %v98_v40  ;;  %v103_v53 = vor.u32 %v102_v45, %v101_v43 }
  0xbd   :  { %v106_v54 = vor.u32 %v105_v48, %v104_v46 }
  0xbe   :  { %v112_v55 = vsel %vm110_vm3, %v100_v52, 2102212464  ;;  %v115_v56 = vsel %vm107_vm2, %v94_v50, %v97_v51  ;;  %v119_v57 = vsel %vm107_vm2, %v97_v51, %v100_v52  ;;  %v116_v59 = vsel %vm110_vm3, %v103_v53, 920167782 }
  0xbf   :  { %v120_v60 = vsel %vm110_vm3, %v106_v54, 1326507024  ;;  %v117_v61 = vsel %vm109_vm4, %v100_v52, %v116_v59  ;;  %v111_v0 = vsel %vm107_vm2, %v91_v58, %v94_v50  ;;  %v113_v1 = vsel %vm109_vm4, %v97_v51, %v112_v55  ;;  %v529_v52 = vld [vmem:[#allocation5 + $0x38] sm:$0xff]   ;;  %v428_v59 = vld [vmem:[%s729_s5] ss:$0 sm:$0xff] }
  0xc0   :  { %v121_v62 = vsel %vm109_vm4, %v103_v53, %v120_v60  ;;  %v118_v2 = vsel %vm108_vm5, %v115_v56, %v117_v61  ;;  %v114_v8 = vsel %vm108_vm5, %v111_v0, %v113_v1  ;;  %490 = vmatpush3.bf16.msra.mxu1 %v529_v52 }
  0xc1   :  { %v122_v3 = vsel %vm108_vm5, %v119_v57, %v121_v62  ;;  %v697_v6 = vmul.u32.u64.low %v123_v63, %v118_v2  ;;  %v698_v7 = vmul.u32.u64.high %v123_v63, %v118_v2, %v697_v6  ;;  %v130_v10 = vmul.u32 %v123_v63, %v114_v8 }
  0xc2   :  { %v694_v4 = vmul.u32.u64.low %v123_v63, %v122_v3  ;;  %v695_v5 = vmul.u32.u64.high %v123_v63, %v122_v3, %v694_v4 }
  0xc3   :  { %v133_v9 = vadd.s32 1, %v698_v7 }
  0xc4   :  { %vm132_vm6 = vc.u32 %v695_v5, %v697_v6  ;;  %v131_v23 = vadd.s32 %v697_v6, %v695_v5 }
  0xc5   :  { %v134_v11 = vsel %vm132_vm6, %v133_v9, %v698_v7 }
  0xc6   :  { %v135_v12 = vadd.s32 %v134_v11, %v130_v10 }
  0xc8   :  { %v136_v13 = vadd.s32 536870912, %v135_v12 }
  0xca   :  { %v137_v14 = vshrl.u32 %v136_v13, 30 }
  0xcc   :  { %v138_v15 = vshll.u32 %v137_v14, 30  ;;  %v161_v36 = vsub.s32 4, %v137_v14 }
  0xce   :  { %v139_v16 = vsub.s32 %v135_v12, %v138_v15  ;;  %v162_v39 = vsel %vm77_vm8, %v161_v36, %v137_v14 }
  0xcf   :  { %v164_v41 = vsel %vm76_vm9, 0, %v162_v39 }
  0xd0   :  { %v141_v17 = vsub.s32 0, %v139_v16  ;;  %v168_v42 = vadd.s32 3, %v164_v41 }
  0xd2   :  { %v417_v18 = vmin.u32 %v141_v17, %v139_v16  ;;  %v169_v43 = vand.u32 3, %v168_v42 }
  0xd4   :  { %v143_v19 = vclz %v417_v18  ;;  %vm174_vm10 = vcmp.eq.s32.totalorder %v169_v43, 2  ;;  %vm171_vm11 = vcmp.eq.s32.totalorder %v169_v43, 0  ;;  %vm170_vm12 = vcmp.lt.s32.totalorder %v169_v43, 2 }
  0xd6   :  { %v418_v20 = vadd.s32 4294967294, %v143_v19 }
  0xd8   :  { %vm419_vm7 = vcmp.lt.s32.totalorder %v418_v20, 0 }
  0xd9   :  { %v146_v21 = vsel %vm419_vm7, 0, %v418_v20 }
  0xda   :  { %v147_v24 = vsub.s32 32, %v146_v21  ;;  %v151_v25 = vsub.s32 4294967266, %v146_v21  ;;  %v148_v26 = vshll.u32 %v139_v16, %v146_v21 }
  0xdc   :  { %v149_v28 = vshrl.u32 %v131_v23, %v147_v24  ;;  %v152_v29 = vadd.s32 127, %v151_v25 }
  0xde   :  { %v150_v30 = vor.u32 %v149_v28, %v148_v26  ;;  %v153_v31 = vshll.u32 %v152_v29, 23 }
  0xe0   :  { %v154_v32 = vor.u32 4788187, %v153_v31  ;;  %v157_v34 = vcvt.s32.f32 %v150_v30 }
  0xe2   :  { %v155_v33 = vand.u32 2147483647, %v154_v32 }
  0xe4   :  { %v158_v35 = vmul.f32 %v157_v34, %v155_v33 }
  0xe6   :  { %v159_v37 = vxor.u32 2147483648, %v158_v35 }
  0xe8   :  { %v160_v38 = vsel %vm77_vm8, %v159_v37, %v158_v35 }
  0xe9   :  { %v163_v40 = vsel %vm76_vm9, %v688_v22, %v160_v38 }
  0xea   :  { %530 = vcosq.f32 %v163_v40 }
  0xeb   :  { %532 = vsinq.f32 %v163_v40 }
  0xf4   :  { %v531_v44 = vpop.eup %530 }
  0xf5   :  { %v533_v45 = vpop.eup %532  ;;  %v175_v46 = vxor.u32 2147483648, %v531_v44 }
  0xf6   :  { %v172_v47 = vxor.u32 2147483648, %v533_v45 }
  0xf7   :  { %v176_v48 = vsel %vm174_vm10, %v175_v46, %v533_v45 }
  0xf8   :  { %v173_v49 = vsel %vm171_vm11, %v531_v44, %v172_v47 }
  0xf9   :  { %v177_v27 = vsel %vm170_vm12, %v173_v49, %v176_v48 }
  0xfa   :  { %v178_v50 = vsel %vm167_vm13, nan, %v177_v27 }
  0xfb   :  { %v179_v51 = vpack.c.bf16 %v178_v50, %v178_v50 }
  0xfd   :  { %472 = vmatmul.mubr.bf16.vlgmr.msra.gmra.mrb[0].mxu0 %v179_v51 }
 0x1d0   :  { %v278_v53 = vpop.f32.mrb[0].mxu0 }
 0x1d1   :  { %v284_v54 = vmax.f32 %v278_v53, 0.0  ;;  %v473_v55 = vpop.f32.mrb[1].mxu0 }
 0x1d2   :  { %v281_v56 = vpop.f32.mrb[2].mxu0 }
 0x1d3   :  { %v285_v57 = vpack.c.bf16 %v284_v54, %v284_v54  ;;  %v474_v58 = vpop.f32.mrb[3].mxu0 }
 0x1d5   :  { %492 = vmatmul.mubr.bf16.vlgmr.msra.gmra.mrb[0].mxu1 %v285_v57 }
 0x2a8   :  { %v391_v22 = vpop.f32.mrb[0].mxu1 }
 0x2a9   :  { %v392_v60 = vadd.f32 %v428_v59, %v391_v22  ;;  %v493_v61 = vpop.f32.mrb[1].mxu1 }
 0x2aa   :  { %v394_v62 = vpop.f32.mrb[2].mxu1 }
 0x2ab   :  { %397 = vst [vmem:[#allocation7] sm:$0xff] %v392_v60  ;;  %v494_v63 = vpop.f32.mrb[3].mxu1 }
 0x2ac   :  { %589 = shalt.err (!%p586_p6)
}
 0x2ad   :  { %s590_s5 = scalar_lea.hbm %s730_s6, 128 }
 0x2ae   :  { %p591_p7 = scmp.ne.s32.totalorder %s730_s6, %s590_s5  ;;  %p594_p8 = scmp.lt.u32.totalorder %s590_s5, %s730_s6 }
 0x2b0   :  { %p596_p9 = pnand %p594_p8, %p591_p7 }
 0x2b2   :  { %599 = shalt.err (!%p596_p9)
}
 0x2b3   :  { %407 = dma.vmem_to_hbm [thread:$0]  %s405_s27, 128, %s730_s6, [#allocation4]  }
 0x2b4   :  { %604 = dma.done.wait [#allocation4], 128  }
 0x2b5   :  { %605 = vsyncadd [#allocation4], 4294967168 }
 0x2b6   :  { %411 = vsyncpa [#allocation3], 1 }
 0x2b7   :  { %412 = vsyncpa [#allocation6], 1 }
 0x2b8   :  { %413 = vsyncpa [#allocation4], 1 }

</bundles_post_ra>
